<compile_context>
chip_gen: v7x
topology: tpu7x:2x2x1
jax: 0.10.0
libtpu: 0.0.40
codegen_flags: <defaults>
</compile_context>

<pallas_src>
import functools

import jax
import jax.numpy as jnp
from jax.experimental import pallas as pl
from jax.experimental.pallas import tpu as pltpu


def _round_up(x, m):
    return (x + m - 1) // m * m


def _default_vmem_budget():
    """Generation-aware VMEM budget (v5e/v6e: 128 MiB, v7x: 64 MiB per core)."""
    cap = 64 * 1024 * 1024
    try:
        cap = int(getattr(pltpu.get_tpu_info(), "vmem_capacity_bytes", cap))
    except Exception:
        pass
    # Leave headroom for compiler-internal scratch.
    return max(24 * 1024 * 1024, min(cap * 55 // 100, 96 * 1024 * 1024))


def _pick_tile_hw(hw128, n, c_in, c_out_blk, x_item, w_item, o_item,
                  budget_bytes, max_tile):
    """Largest multiple-of-128 divisor of hw128 whose double-buffered x/out
    tiles plus the (double-buffered) weight/bias blocks fit the VMEM budget."""
    fixed = 2 * (c_in * c_out_blk * w_item + c_out_blk * 4)   # W + bias, 2 bufs
    per_lane = 2 * (c_in * x_item + c_out_blk * o_item)       # 2x-buffered x + out
    avail = max(budget_bytes - fixed, per_lane * 128)
    cap = (avail // per_lane) // 128 * 128
    cap = max(128, min(int(cap), max_tile, hw128))
    # Keep at least ~8 grid steps total (megacore sharding + pipeline overlap).
    steps_cap = max(128, (n * hw128 // 8) // 128 * 128)
    cap = max(128, min(cap, steps_cap))
    m = hw128 // 128
    best = 1
    for d in range(1, m + 1):
        if m % d == 0 and d * 128 <= cap:
            best = d
    return best * 128


def _conv_bn_act_kernel(w_ref, b_ref, x_ref, o_ref, *, apply_relu, compute_dtype):
    # w_ref: (TILE_CO, C_in)   BN scale folded in, compute_dtype
    # b_ref: (TILE_CO, 1)      folded BN bias, f32
    # x_ref: (C_in, TILE_HW)   one lane tile of one image (original input dtype)
    # o_ref: (TILE_CO, TILE_HW)
    x = x_ref[...].astype(compute_dtype)      # in-kernel cast: no extra HBM pass
    y = jnp.dot(w_ref[...], x, preferred_element_type=jnp.float32)
    y = y + b_ref[...]
    if apply_relu:
        y = jnp.maximum(y, 0.0)
    o_ref[...] = y.astype(o_ref.dtype)


def conv_bn_relu(x_nchw, conv_w, gamma, beta, run_mean, run_var, *,
                 eps=1e-5, apply_relu=True,
                 compute_dtype=jnp.bfloat16, out_dtype=None,
                 vmem_budget_bytes=None):
    """Fused 1x1 Conv2d (no bias) + BatchNorm2d (eval) + optional ReLU.

    x_nchw : (N, C_in, H, W)
    conv_w : (C_out, C_in, 1, 1)  (PyTorch Conv2d weight layout)
    compute_dtype : MXU input dtype (bf16 = native MXU rate; f32 for parity)
    out_dtype     : output dtype in HBM (default: x dtype)
    """
    N, C_in, H, W = x_nchw.shape
    C_out = conv_w.shape[0]
    HW = H * W
    out_dtype = x_nchw.dtype if out_dtype is None else out_dtype

    # ---- glue (plain JAX, cheap): BN folding into W / bias, no transposes ----
    scale = gamma / jnp.sqrt(run_var + eps)                          # (C_out,)
    w_mat = (conv_w.reshape(C_out, C_in) * scale[:, None]).astype(compute_dtype)
    bias = (beta - run_mean * scale).reshape(C_out, 1).astype(jnp.float32)

    x3 = x_nchw.reshape(N, C_in, HW)               # free reshape (stays NCHW)
    hw128 = _round_up(HW, 128)
    if hw128 != HW:                                # at most 127 padded lanes
        x3 = jnp.pad(x3, ((0, 0), (0, 0), (0, hw128 - HW)))

    # C_out tiling: bounds the resident weight slab and keeps MXU alignment.
    tile_co = 256 if (C_out > 256 and C_out % 256 == 0) else C_out

    budget = _default_vmem_budget() if vmem_budget_bytes is None else vmem_budget_bytes
    x_item = jnp.dtype(x3.dtype).itemsize
    w_item = jnp.dtype(compute_dtype).itemsize
    o_item = jnp.dtype(out_dtype).itemsize
    max_tile = 8192 if budget >= 48 * 1024 * 1024 else 4096
    tile_hw = _pick_tile_hw(hw128, N, C_in, tile_co, x_item, w_item, o_item,
                            budget, max_tile)

    grid = (N, C_out // tile_co, hw128 // tile_hw)
    kernel = functools.partial(_conv_bn_act_kernel,
                               apply_relu=apply_relu,
                               compute_dtype=compute_dtype)

    cost = pl.CostEstimate(
        flops=2 * N * hw128 * C_in * C_out,
        transcendentals=0,
        bytes_accessed=(N * C_in * hw128 * x_item
                        + C_in * C_out * w_item + C_out * 4
                        + N * C_out * hw128 * o_item),
    )

    out3 = pl.pallas_call(
        kernel,
        out_shape=jax.ShapeDtypeStruct((N, C_out, hw128), out_dtype),
        grid_spec=pltpu.PrefetchScalarGridSpec(
            num_scalar_prefetch=0,
            grid=grid,
            in_specs=[
                # weights & bias: constant over (n, j) -> fetched once per co block
                pl.BlockSpec((tile_co, C_in), lambda n, co, j: (co, 0)),
                pl.BlockSpec((tile_co, 1), lambda n, co, j: (co, 0)),
                # x: per-image, lane-tiled over H*W (batch dim squeezed)
                pl.BlockSpec((None, C_in, tile_hw), lambda n, co, j: (n, 0, j)),
            ],
            out_specs=pl.BlockSpec((None, tile_co, tile_hw),
                                   lambda n, co, j: (n, co, j)),
        ),
        compiler_params=pltpu.CompilerParams(
            dimension_semantics=("parallel", "parallel", "parallel"),
            vmem_limit_bytes=min(budget + 8 * 1024 * 1024, 128 * 1024 * 1024),
        ),
        cost_estimate=cost,
    )(w_mat, bias, x3)

    if hw128 != HW:
        out3 = out3[:, :, :HW]
    return out3.reshape(N, C_out, H, W)


def _reference(x_nchw, conv_w, gamma, beta, run_mean, run_var, eps=1e-5,
               apply_relu=True):
    # pure-JAX reference of Conv2d(k=1, no bias) + BN(eval) + ReLU
    y = jnp.einsum("nchw,oc->nohw", x_nchw, conv_w.reshape(conv_w.shape[0], -1))
    s = gamma / jnp.sqrt(run_var + eps)
    b = beta - run_mean * s
    y = y * s[None, :, None, None] + b[None, :, None, None]
    if apply_relu:
        y = jnp.maximum(y, 0.0)
    return y


if __name__ == "__main__":
    key = jax.random.PRNGKey(0)
    k1, k2, k3, k4, k5, k6 = jax.random.split(key, 6)

    N, C_in, H, W = 2, 4, 16, 16
    C_out = 8

    x = jax.random.normal(k1, (N, C_in, H, W), dtype=jnp.float32)
    conv_w = jax.random.normal(k2, (C_out, C_in, 1, 1), dtype=jnp.float32) * 0.1
    gamma = 1.0 + 0.1 * jax.random.normal(k3, (C_out,), dtype=jnp.float32)
    beta = 0.1 * jax.random.normal(k4, (C_out,), dtype=jnp.float32)
    run_mean = 0.1 * jax.random.normal(k5, (C_out,), dtype=jnp.float32)
    run_var = jnp.abs(jax.random.normal(k6, (C_out,), dtype=jnp.float32)) + 0.5

    ref = _reference(x, conv_w, gamma, beta, run_mean, run_var, apply_relu=True)

    # f32 parity path (matches PyTorch numerics)
    out_f32 = conv_bn_relu(x, conv_w, gamma, beta, run_mean, run_var,
                           apply_relu=True,
                           compute_dtype=jnp.float32, out_dtype=jnp.float32)
    out_f32 = jax.block_until_ready(out_f32)
    assert out_f32.shape == (N, C_out, H, W)
    assert jnp.allclose(out_f32, ref, atol=1e-4, rtol=1e-4)

    # bf16 production path (default compute dtype, bf16 output)
    out_bf16 = conv_bn_relu(x, conv_w, gamma, beta, run_mean, run_var,
                            apply_relu=True,
                            compute_dtype=jnp.bfloat16, out_dtype=jnp.bfloat16)
    out_bf16 = jax.block_until_ready(out_bf16)
    assert out_bf16.shape == (N, C_out, H, W)
    assert out_bf16.dtype == jnp.bfloat16
    assert jnp.allclose(out_bf16.astype(jnp.float32), ref, atol=5e-2, rtol=5e-2)

    print("KERNEL_OK")
</pallas_src>

<mosaic_0001>
module attributes {stable_mosaic.version = 11 : i64} {
  func.func @_conv_bn_act_kernel(%arg0: i32, %arg1: i32, %arg2: i32, %arg3: memref<8x4xf32, #tpu.memory_space<vmem>>, %arg4: memref<8x1xf32, #tpu.memory_space<vmem>>, %arg5: memref<1x4x128xf32, #tpu.memory_space<vmem>>, %arg6: memref<1x8x128xf32, #tpu.memory_space<vmem>>) attributes {dimension_semantics = [#tpu.dimension_semantics<parallel>, #tpu.dimension_semantics<parallel>, #tpu.dimension_semantics<parallel>], iteration_bounds = array<i64: 2, 1, 2>, scalar_prefetch = 0 : i64, scratch_operands = 0 : i64, tpu.core_type = #tpu.core_type<tc>, window_params = [{transform_indices = @transform_0, window_bounds = array<i64: 8, 4>}, {transform_indices = @transform_1, window_bounds = array<i64: 8, 1>}, {transform_indices = @transform_2, window_bounds = array<i64: 1, 4, 128>}, {transform_indices = @transform_3, window_bounds = array<i64: 1, 8, 128>}]} {
    %c0 = arith.constant 0 : index
    %c0_0 = arith.constant 0 : index
    %c0_1 = arith.constant 0 : index
    %0 = vector.load %arg5[%c0, %c0_0, %c0_1] : memref<1x4x128xf32, #tpu.memory_space<vmem>>, vector<1x4x128xf32>
    %1 = vector.shape_cast %0 : vector<1x4x128xf32> to vector<4x128xf32>
    %c0_2 = arith.constant 0 : index
    %c0_3 = arith.constant 0 : index
    %2 = vector.load %arg3[%c0_2, %c0_3] : memref<8x4xf32, #tpu.memory_space<vmem>>, vector<8x4xf32>
    %cst = arith.constant dense<0.000000e+00> : vector<8x128xf32>
    %3 = tpu.matmul %2, %1, %cst {dimension_numbers = #tpu.dot_dimension_numbers<[1], [0], [0], [1], [0, 0, 1, 1], [], []>} : vector<8x4xf32>, vector<4x128xf32>, vector<8x128xf32> -> vector<8x128xf32>
    %c0_4 = arith.constant 0 : index
    %c0_5 = arith.constant 0 : index
    %4 = vector.load %arg4[%c0_4, %c0_5] : memref<8x1xf32, #tpu.memory_space<vmem>>, vector<8x1xf32>
    %5 = vector.broadcast %4 : vector<8x1xf32> to vector<8x128xf32>
    %6 = arith.addf %3, %5 : vector<8x128xf32>
    %cst_6 = arith.constant 0.000000e+00 : f32
    %7 = vector.broadcast %cst_6 : f32 to vector<8x128xf32>
    %8 = arith.maximumf %6, %7 : vector<8x128xf32>
    %c0_7 = arith.constant 0 : index
    %c0_8 = arith.constant 0 : index
    %c0_9 = arith.constant 0 : index
    %9 = vector.load %arg6[%c0_7, %c0_8, %c0_9] : memref<1x8x128xf32, #tpu.memory_space<vmem>>, vector<1x8x128xf32>
    %10 = vector.shape_cast %9 : vector<1x8x128xf32> to vector<8x128xf32>
    %11 = vector.shape_cast %8 : vector<8x128xf32> to vector<1x8x128xf32>
    tpu.vector_store %arg6[%c0_7, %c0_8, %c0_9], %11 {strides = array<i32>} : memref<1x8x128xf32, #tpu.memory_space<vmem>>, vector<1x8x128xf32>,
    return
  }
  func.func @transform_0(%arg0: i32, %arg1: i32, %arg2: i32) -> (i32, i32) {
    %c0_i32 = arith.constant 0 : i32
    %c0_i32_0 = arith.constant 0 : i32
    return %arg1, %c0_i32 : i32, i32
  }
  func.func @transform_1(%arg0: i32, %arg1: i32, %arg2: i32) -> (i32, i32) {
    %c0_i32 = arith.constant 0 : i32
    %c0_i32_0 = arith.constant 0 : i32
    return %arg1, %c0_i32 : i32, i32
  }
  func.func @transform_2(%arg0: i32, %arg1: i32, %arg2: i32) -> (i32, i32, i32) {
    %c0_i32 = arith.constant 0 : i32
    %c0_i32_0 = arith.constant 0 : i32
    return %arg0, %c0_i32, %arg2 : i32, i32, i32
  }
  func.func @transform_3(%arg0: i32, %arg1: i32, %arg2: i32) -> (i32, i32, i32) {
    %c0_i32 = arith.constant 0 : i32
    return %arg0, %arg1, %arg2 : i32, i32, i32
  }
}

</mosaic_0001>

<bundles_post_ra>
// kernel: tpu_custom_call.1
= control target key start
LH: loop header
LB: loop body
LE: loop exit
PB: predicated region body
PF: predicated region fallthrough
CT: control target
= control target key end

     0   :  { %8 = vsyncpa [#allocation3], 0  ;;  %s818_s0 = inlined_call_operand.vmem [shape: f32[8,4], index: 0, kind: input, shape index: {}]   ;;  %s819_s1 = inlined_call_operand.vmem [shape: f32[8,1], index: 1, kind: input, shape index: {}]   ;;  %s820_s2 = inlined_call_operand.vmem [shape: f32[2,4,256], index: 2, kind: input, shape index: {}]   ;;  %s821_s3 = inlined_call_operand.hbm [shape: f32[2,8,256], index: 3, kind: output, shape index: {}]  }
   0x1   :  { %10 = vsyncpa [#allocation3 + $0x1], 0  ;;  %s675_s12 = smov 0   ;;  %s677_s13 = smov 0  }
   0x2   :  { %s679_s14 = smov 0   ;;  %s681_s15 = smov 0  }
   0x3   :  { %s683_s16 = smov 0   ;;  %s685_s17 = smov 0  }
   0x4   :  { %s687_s18 = smov 0   ;;  %s689_s19 = smov 0  }
   0x5 LB: > { %s456_s20 = sadd.s32 4294967295, %s649_s19   ;;  %s457_s21 = sadd.s32 4294967294, %s649_s19   ;;  %s649_s19 = sphi %s689_s19, %s16_s19   ;;  %s645_s18 = sphi %s687_s18, %s830_s18   ;;  %s641_s17 = sphi %s685_s17, %s829_s17   ;;  %s637_s16 = sphi %s683_s16, %s828_s16   ;;  %s633_s15 = sphi %s681_s15, %s827_s15   ;;  %s629_s14 = sphi %s679_s14, %s826_s14   ;;  %s625_s13 = sphi %s677_s13, %s825_s13   ;;  %s621_s12 = sphi %s675_s12, %s824_s12  }
   0x6   : > { %s28_s22 = sadd.s32 1, %s641_s17  ;;  %s35_s23 = sadd.s32 1, %s645_s18 }
   0x7   : > { %p29_p0 = scmp.ge.s32.totalorder %s28_s22, 2  ;;  %p136_p1 = scmp.ne.s32.totalorder %s629_s14, %s625_s13 }
   0x8   : > { %p137_p2 = scmp.eq.s32.totalorder %s456_s20, 3  ;;  %p142_p5 = scmp.ne.s32.totalorder %s625_s13, %s621_s12 }
   0x9   : > { %s832_s22 = smov (%p29_p0, %s28_s22), 0  ;;  %s834_s23 = smov (!%p29_p0, %s35_s23), %s645_s18 }
   0xa   : > { %s122_s24 = ssub.s32 %s641_s17, %s832_s22  ;;  %p726_p3 = por %p137_p2, %p136_p1 }
   0xb   : > { %p37_p4 = scmp.ge.s32.totalorder %s834_s23, 2  ;;  %p143_p6 = scmp.eq.s32.totalorder %s457_s21, 3 }
   0xc   : > { %p462_p7 = scmp.ge.s32.totalorder %s649_s19, 1  ;;  %p186_p9 = scmp.lt.s32.totalorder %s649_s19, 5 }
   0xd   : > { %s836_s23 = smov (%p37_p4, %s834_s23), 0  ;;  %p735_p8 = por %p143_p6, %p142_p5 }
   0xe   : > { %s119_s27 = ssub.s32 %s645_s18, %s836_s23  ;;  %s126_s28 = sadd.s32 1, %s629_s14 }
   0xf   : > { %s123_s29 = sor.u32 %s122_s24, %s119_s27  ;;  %p187_p10 = pnand %p462_p7, %p186_p9 }
  0x10   : > { %p124_p11 = scmp.eq.s32.totalorder %s123_s29, 0  ;;  %p229_p12 = scmp.lt.s32.totalorder (!%p187_p10), %s637_s16, 1  ;;  %v651_v0 = vmov (!%p187_p10), 0.0   ;;  %vm652_vm0 = vmmov (!%p187_p10), 0   ;;  %v239_v1 = vld [vmem:[%s819_s1] sm:$0xff] (!%p187_p10)  ;;  %v653_v2 = vmov (!%p187_p10), 0  }
  0x11   : > { %190 = sbr.rel (%p187_p10) target bundleno = 262 (0x106), region = 32  ;;  %p231_p13 = scmp.lt.s32.totalorder (!%p187_p10), %s633_s15, 1  ;;  %475 = vmatprep.subr.mxu0 (!%p187_p10), %v651_v0  ;;  %477 = vmatprep.mubr.msk.f32.mxu0 (!%p187_p10), %vm652_vm0, %v651_v0  ;;  %vm249_vm1 = vcmask (!%p187_p10), 1043456   ;;  %v238_v3 = vld [vmem:[%s818_s0] sm:$0xff] (!%p187_p10)  ;;  %vm245_vm2 = vcmask (!%p187_p10), 31744  }
  0x12   : > { %s744_s30 = scalar_select %p124_p11, %s629_s14, %s126_s28  }
  0x13   : > { %554 = vset.pattern.permute.xlu0 (!%p187_p10), %v653_v2  ;;  %s218_s28 = sand.u32 (!%p187_p10), 1, %s625_s13   ;;  %s469_s4 = sshll.u32 (!%p187_p10), %s637_s16, 1 }
  0x14   : > { %242 = vperm.xlu0 (!%p187_p10), %554, %v239_v1   ;;  %s463_s29 = sshll.u32 (!%p187_p10), %s218_s28, 3  ;;  %s339_s5 = sadd.s32 (!%p187_p10), %s633_s15, %s469_s4 }
  0x15   : > { %s654_s20 = smov (!%p187_p10), [#allocation2]  }
  0x18   : > { %s230_s6 = scalar_select %p229_p12, %s637_s16, 1 }
  0x19   : > { %s232_s7 = scalar_select %p231_p13, %s633_s15, 1 }
  0x1a   : > { %s464_s8 = sshll.u32 %s230_s6, 1  ;;  %s470_s6 = sshll.u32 %s339_s5, 7 }
  0x1b   : > { %s234_s9 = sadd.s32 %s464_s8, %s232_s7  ;;  %s220_s7 = scalar_lea.vmem [#allocation2], %s463_s29 }
  0x1c   : > { %s465_s10 = sshll.u32 %s234_s9, 2  ;;  %s343_s8 = sshll.u32 %s220_s7, 4  ;;  %s767_s8 = int_to_ptr.vmem [resolvable:$true] %s343_s8 }
  0x1d   : > { %s236_s21 = scalar_lea.vmem %s820_s2, %s465_s10  ;;  %s765_s11 = scalar_lea.hbm %s821_s3, %s470_s6 }
  0x1e   : > { %v237_v4 = vld [vmem:[%s236_s21] sm:$0xf]  ;;  %s326_s15 = scalar_lea.sflag [#allocation3], %s218_s28  ;;  %s555_s16 = scalar_lea.vmem %s767_s8, 128 }
  0x1f   : > { %476 = vmatpush3.msk.msra.mxu0 %vm249_vm1, %v237_v4  ;;  %p556_p0 = scmp.ne.s32.totalorder %s767_s8, %s555_s16  ;;  %s559_s21 = sshll.u32 %s654_s20, 4  ;;  %s560_s21 = int_to_ptr.vmem [resolvable:$false] %s559_s21 }
  0x20   : > { %478 = vmatmul.mubr.msk.f32.vlgmr.msra.gmra.mrb[0].mxu0 %vm245_vm2, %v238_v3  ;;  %s561_s24 = scalar_lea.vmem %s560_s21, 256  ;;  %p562_p4 = scmp.lt.s32.totalorder %s767_s8, %s560_s21 }
  0x21   : > { %p557_p1 = pnand %p556_p0, %p726_p3  ;;  %p563_p5 = scmp.lt.s32.totalorder %s561_s24, %s555_s16 }
  0x23   : > { %p558_p2 = pneg %p557_p1  ;;  %p564_p6 = por %p563_p5, %p562_p4 }
  0x25   : > { %p565_p7 = pnand %p564_p6, %p558_p2 }
  0x93   : > { %v243_v5 = vpop.permute.xlu0 %242 }
  0xf3   : > { %v319_v6 = vpop.f32.mrb[0].mxu0 }
  0xf4   : > { %v320_v7 = vadd.f32 %v319_v6, %v243_v5  ;;  %v479_v8 = vpop.f32.mrb[1].mxu0 }
  0xf6   : > { %v323_v9 = vmax.f32 %v320_v7, 0.0 }
  0xf8   : > { %324 = vst [vmem:[%s220_s7] sm:$0xff] %v323_v9 }
  0xf9   : > { %568 = shalt.err (!%p565_p7)
}
  0xfa   : > { %s569_s27 = scalar_lea.hbm %s765_s11, 128  ;;  %s573_s4 = scalar_lea.hbm %s821_s3, 512 }
  0xfb   : > { %p570_p9 = scmp.ne.s32.totalorder %s765_s11, %s569_s27  ;;  %p574_p12 = scmp.lt.u32.totalorder %s765_s11, %s821_s3 }
  0xfc   : > { %p575_p13 = scmp.lt.u32.totalorder %s573_s4, %s569_s27  ;;  %p577_p1 = scmp.lt.u32.totalorder %s569_s27, %s765_s11 }
  0xfd   : > { %p571_p10 = pnand %p570_p9, %p726_p3 }
  0xfe   : > { %p576_p0 = por %p575_p13, %p574_p12 }
  0xff   : > { %p572_p11 = pneg %p571_p10 }
 0x100   : > { %p578_p2 = por %p577_p1, %p576_p0 }
 0x102   : > { %p579_p4 = pnand %p578_p2, %p572_p11 }
 0x104   : > { %582 = shalt.err (!%p579_p4)
}
 0x105   : > { %480 = dma.vmem_to_hbm [thread:$0]  (%p726_p3), %s767_s8, 128, %s765_s11, %s326_s15  }
 0x106 PF: > { %p486_p5 = scmp.ge.s32.totalorder %s649_s19, 2  ;;  %s355_s7 = sand.u32 1, %s621_s12  }
 0x107   : > { %s356_s9 = scalar_lea.sflag [#allocation3], %s355_s7 }
 0x108   : > { %p483_p6 = pnand %p486_p5, %p735_p8 }
 0x10a   : > { %616 = dma.done.wait (!%p483_p6), %s356_s9, 128  }
 0x10b   : > { %618 = vsyncadd (!%p483_p6), %s356_s9, 4294967168  ;;  %s16_s19 = sadd.s32 1, %s649_s19   ;;  %s824_s12 = smov %s625_s13 }
 0x10c   : > { %p13_p7 = scmp.ge.s32.totalorder %s16_s19, 6   ;;  %s825_s13 = smov %s629_s14 }
 0x10d   : > { %s826_s14 = smov %s744_s30  ;;  %s827_s15 = smov %s641_s17 }
 0x10e   : > { %s828_s16 = smov %s645_s18  ;;  %s829_s17 = smov %s832_s22 }
 0x10f   : > { %s830_s18 = smov %s836_s23  ;;  %15 = sbr.rel (!%p13_p7) target bundleno = 5 (0x5), region = 73 }
 0x116   :  { %361 = vsyncpa [#allocation3], 1 }
 0x117   :  { %363 = vsyncpa [#allocation3 + $0x1], 1 }

</bundles_post_ra>
